<compile_context>
chip_gen: v7x
topology: tpu7x:2x2x1
jax: 0.10.0
libtpu: 0.0.40
codegen_flags: <defaults>
</compile_context>

<pallas_src>
import functools

import jax
import jax.numpy as jnp
from jax.experimental import pallas as pl
from jax.experimental.pallas import tpu as pltpu


def _vmem_capacity_bytes():
    try:
        return int(pltpu.get_tpu_info().vmem_capacity_bytes)
    except Exception:
        return 128 * 1024 * 1024


def _device_kind():
    try:
        return jax.devices()[0].device_kind.lower()
    except Exception:
        return ""


# ---------------------------------------------------------------------------
# Pass 1: K/V projection (once per batch element).  Emits bf16 V (L, E) and
# bf16 K pre-transposed (E, L) so the attention kernel never transposes K.
# ---------------------------------------------------------------------------
def kv_proj_kernel(x_ref, wk_ref, bk_ref, wv_ref, bv_ref, kt_ref, v_ref):
    x = x_ref[0]                                                         # (L, E) bf16
    k = jnp.dot(x, wk_ref[...], preferred_element_type=jnp.float32) + bk_ref[...]
    v = jnp.dot(x, wv_ref[...], preferred_element_type=jnp.float32) + bv_ref[...]
    kt_ref[0] = k.T.astype(jnp.bfloat16)        # one XLU transpose per batch element
    v_ref[0] = v.astype(jnp.bfloat16)


# ---------------------------------------------------------------------------
# Pass 2: Q projection + per-head softmax attention + output projection.
# Grid = (B, L // tq), both axes "parallel" (no cross-step state).
# ---------------------------------------------------------------------------
def attn_kernel(x_ref, kt_ref, v_ref, wq_ref, bq_ref, wo_ref, bo_ref,
                out_ref, z_scr, *, num_heads, head_dim, exp_in_bf16):
    # Q projection for this query tile (1/sqrt(D) already folded into Wq/bq).
    xq = x_ref[0]                                                        # (tq, E) bf16
    q = (jnp.dot(xq, wq_ref[...], preferred_element_type=jnp.float32)
         + bq_ref[...]).astype(jnp.bfloat16)

    # Per-head attention; K/V are ref-sliced (only one head's tile live at a time).
    for h in range(num_heads):
        sl = slice(h * head_dim, (h + 1) * head_dim)
        kt_h = kt_ref[0, sl, :]                                          # (D, L) bf16
        v_h = v_ref[0, :, sl]                                            # (L, D) bf16
        s = jnp.dot(q[:, sl], kt_h, preferred_element_type=jnp.float32)  # (tq, L) f32
        s = s - jnp.max(s, axis=-1, keepdims=True)
        # bf16 exp on v6e/v7x (bf16 EUP); f32 on v5e.
        p = jnp.exp(s.astype(jnp.bfloat16)) if exp_in_bf16 else jnp.exp(s)
        l = jnp.sum(p.astype(jnp.float32), axis=-1, keepdims=True)       # (tq, 1) f32
        inv = pl.reciprocal(l, approx=True)                              # EUP slot
        zh = jnp.dot(p.astype(jnp.bfloat16), v_h,
                     preferred_element_type=jnp.float32)                 # (tq, D) f32
        # Normalize the small (tq, D) PV result instead of the (tq, L) weights.
        z_scr[:, sl] = (zh * inv).astype(jnp.bfloat16)

    # Output projection straight from the bf16 z scratch.
    out_ref[0] = (jnp.dot(z_scr[...], wo_ref[...],
                          preferred_element_type=jnp.float32) + bo_ref[...])


def mha_forward(x, wq, bq, wk, bk, wv, bv, wo, bo, *, num_heads, tq=None):
    B, L, E = x.shape
    assert E % num_heads == 0
    head_dim = E // num_heads
    out_dim = wo.shape[0]
    scale = float(head_dim) ** 0.5

    cap = _vmem_capacity_bytes()
    kind = _device_kind()
    exp_in_bf16 = ("v6" in kind) or ("v7" in kind)      # v5e: no bf16 EUP path

    # Generation-aware query-tile size: 512 on 128-MiB parts, 256 on v7x.
    if tq is None:
        pref = 512 if cap >= 96 * 1024 * 1024 else 256
        tq = pref if (L > pref and L % pref == 0) else L
    assert L % tq == 0
    n_qt = L // tq

    # Glue: pre-transpose Linear weights (out,in)->(in,out), cast MXU operands to
    # bf16, fold 1/sqrt(D) into the query projection.  Biases stay f32.
    wq_t = (wq.T / scale).astype(jnp.bfloat16)
    wk_t = wk.T.astype(jnp.bfloat16)
    wv_t = wv.T.astype(jnp.bfloat16)
    wo_t = wo.T.astype(jnp.bfloat16)
    bq2 = (bq / scale).reshape(1, E).astype(jnp.float32)
    bk2 = bk.reshape(1, E).astype(jnp.float32)
    bv2 = bv.reshape(1, E).astype(jnp.float32)
    bo2 = bo.reshape(1, out_dim).astype(jnp.float32)
    xb = x.astype(jnp.bfloat16)

    bf16, f32 = 2, 4
    vmem_cap = int(0.8 * cap)    # headroom for compiler-internal scratch

    # ---------------- pass 1: K/V projection ----------------
    proj_block = (L * E * bf16 + 2 * E * E * bf16 + 2 * E * f32
                  + E * L * bf16 + L * E * bf16)
    proj_limit = int(min(max(4 * proj_block, 4 << 20), vmem_cap))
    kt, v_be = pl.pallas_call(
        kv_proj_kernel,
        out_shape=(jax.ShapeDtypeStruct((B, E, L), jnp.bfloat16),   # K^T (pre-transposed)
                   jax.ShapeDtypeStruct((B, L, E), jnp.bfloat16)),  # V (lane-dense)
        grid=(B,),
        in_specs=[
            pl.BlockSpec((1, L, E), lambda b: (b, 0, 0)),
            pl.BlockSpec((E, E), lambda b: (0, 0)),
            pl.BlockSpec((1, E), lambda b: (0, 0)),
            pl.BlockSpec((E, E), lambda b: (0, 0)),
            pl.BlockSpec((1, E), lambda b: (0, 0)),
        ],
        out_specs=(pl.BlockSpec((1, E, L), lambda b: (b, 0, 0)),
                   pl.BlockSpec((1, L, E), lambda b: (b, 0, 0))),
        compiler_params=pltpu.CompilerParams(
            dimension_semantics=("parallel",),
            vmem_limit_bytes=proj_limit),
    )(xb, wk_t, bk2, wv_t, bv2)

    # ---------------- pass 2: attention ----------------
    kernel = functools.partial(attn_kernel, num_heads=num_heads,
                               head_dim=head_dim, exp_in_bf16=exp_in_bf16)
    attn_block = (tq * E * bf16 + E * L * bf16 + L * E * bf16
                  + E * E * bf16 + E * f32
                  + E * out_dim * bf16 + out_dim * f32
                  + tq * out_dim * f32)
    attn_limit = int(min(max(4 * attn_block + 2 * tq * E * bf16, 4 << 20), vmem_cap))
    out = pl.pallas_call(
        kernel,
        out_shape=jax.ShapeDtypeStruct((B, L, out_dim), jnp.float32),
        grid=(B, n_qt),
        in_specs=[
            pl.BlockSpec((1, tq, E), lambda b, qi: (b, qi, 0)),      # x (query tile only)
            pl.BlockSpec((1, E, L), lambda b, qi: (b, 0, 0)),        # K^T (bf16, resident)
            pl.BlockSpec((1, L, E), lambda b, qi: (b, 0, 0)),        # V   (bf16, resident)
            pl.BlockSpec((E, E), lambda b, qi: (0, 0)),              # Wq^T (pre-scaled)
            pl.BlockSpec((1, E), lambda b, qi: (0, 0)),              # bq   (pre-scaled)
            pl.BlockSpec((E, out_dim), lambda b, qi: (0, 0)),        # Wo^T
            pl.BlockSpec((1, out_dim), lambda b, qi: (0, 0)),        # bo
        ],
        out_specs=pl.BlockSpec((1, tq, out_dim), lambda b, qi: (b, qi, 0)),
        scratch_shapes=[pltpu.VMEM((tq, E), jnp.bfloat16)],          # concatenated heads
        compiler_params=pltpu.CompilerParams(
            dimension_semantics=("parallel", "parallel"),
            vmem_limit_bytes=attn_limit),
    )(xb, kt, v_be, wq_t, bq2, wo_t, bo2)

    # bf16 kernel outputs -> PyTorch's (B, H, L, D) f32 layout in the wrapper.
    K = kt.astype(jnp.float32).reshape(B, num_heads, head_dim, L).transpose(0, 1, 3, 2)
    V = v_be.astype(jnp.float32).reshape(B, L, num_heads, head_dim).transpose(0, 2, 1, 3)
    return out, K, V


def mha_reference(x, wq, bq, wk, bk, wv, bv, wo, bo, *, num_heads):
    """Pure-JAX (f32) reference mirroring the PyTorch forward exactly."""
    B, L, E = x.shape
    D = E // num_heads
    scale = float(D) ** 0.5

    Q = x @ wq.T + bq
    K = x @ wk.T + bk
    V = x @ wv.T + bv
    Qh = Q.reshape(B, L, num_heads, D).transpose(0, 2, 1, 3)
    Kh = K.reshape(B, L, num_heads, D).transpose(0, 2, 1, 3)
    Vh = V.reshape(B, L, num_heads, D).transpose(0, 2, 1, 3)

    s = jnp.einsum('bhqd,bhkd->bhqk', Qh, Kh) / scale
    w = jax.nn.softmax(s, axis=-1)
    z = jnp.einsum('bhqk,bhkd->bhqd', w, Vh)
    z = z.transpose(0, 2, 1, 3).reshape(B, L, E)
    out = z @ wo.T + bo
    return out, Kh, Vh


if __name__ == "__main__":
    # Small deterministic configuration.
    B, L = 2, 8
    emb_dim, num_heads, output_dim = 32, 4, 16
    head_dim = emb_dim // num_heads

    key = jax.random.PRNGKey(0)
    keys = jax.random.split(key, 9)

    def linear_init(kw, kb, out_f, in_f):
        bound = 1.0 / (in_f ** 0.5)
        w = jax.random.uniform(kw, (out_f, in_f), jnp.float32, -bound, bound)
        b = jax.random.uniform(kb, (out_f,), jnp.float32, -bound, bound)
        return w, b

    wq, bq = linear_init(keys[0], keys[1], emb_dim, emb_dim)
    wk, bk = linear_init(keys[2], keys[3], emb_dim, emb_dim)
    wv, bv = linear_init(keys[4], keys[5], emb_dim, emb_dim)
    wo, bo = linear_init(keys[6], keys[7], output_dim, emb_dim)
    x = jax.random.normal(keys[8], (B, L, emb_dim), jnp.float32)

    out, K, V = mha_forward(x, wq, bq, wk, bk, wv, bv, wo, bo,
                            num_heads=num_heads)
    jax.block_until_ready((out, K, V))

    out_ref, k_ref, v_ref = mha_reference(x, wq, bq, wk, bk, wv, bv, wo, bo,
                                          num_heads=num_heads)

    assert out.shape == (B, L, output_dim)
    assert K.shape == (B, num_heads, L, head_dim)
    assert V.shape == (B, num_heads, L, head_dim)
    # bf16 MXU operands / bf16 K,V storage (f32 accumulation) => loosened tolerance.
    assert jnp.allclose(out, out_ref, atol=3e-2, rtol=3e-2)
    assert jnp.allclose(K, k_ref, atol=3e-2, rtol=3e-2)
    assert jnp.allclose(V, v_ref, atol=3e-2, rtol=3e-2)

    print("KERNEL_OK")
</pallas_src>

<mosaic_0001>
module attributes {stable_mosaic.version = 11 : i64} {
  func.func @kv_proj_kernel(%arg0: i32, %arg1: memref<1x8x32xbf16, #tpu.memory_space<vmem>>, %arg2: memref<32x32xbf16, #tpu.memory_space<vmem>>, %arg3: memref<1x32xf32, #tpu.memory_space<vmem>>, %arg4: memref<32x32xbf16, #tpu.memory_space<vmem>>, %arg5: memref<1x32xf32, #tpu.memory_space<vmem>>, %arg6: memref<1x32x8xbf16, #tpu.memory_space<vmem>>, %arg7: memref<1x8x32xbf16, #tpu.memory_space<vmem>>) attributes {dimension_semantics = [#tpu.dimension_semantics<parallel>], iteration_bounds = array<i64: 2>, scalar_prefetch = 0 : i64, scratch_operands = 0 : i64, tpu.core_type = #tpu.core_type<tc>, window_params = [{transform_indices = @transform_0, window_bounds = array<i64: 1, 8, 32>}, {pipeline_mode = #tpu.pipeline_mode<synchronous>, transform_indices = @transform_1, window_bounds = array<i64: 32, 32>}, {pipeline_mode = #tpu.pipeline_mode<synchronous>, transform_indices = @transform_2, window_bounds = array<i64: 1, 32>}, {pipeline_mode = #tpu.pipeline_mode<synchronous>, transform_indices = @transform_3, window_bounds = array<i64: 32, 32>}, {pipeline_mode = #tpu.pipeline_mode<synchronous>, transform_indices = @transform_4, window_bounds = array<i64: 1, 32>}, {transform_indices = @transform_5, window_bounds = array<i64: 1, 32, 8>}, {transform_indices = @transform_6, window_bounds = array<i64: 1, 8, 32>}]} {
    %c0 = arith.constant 0 : index
    %c0_0 = arith.constant 0 : index
    %c0_1 = arith.constant 0 : index
    %0 = vector.load %arg1[%c0, %c0_0, %c0_1] : memref<1x8x32xbf16, #tpu.memory_space<vmem>>, vector<1x8x32xbf16>
    %1 = vector.shape_cast %0 : vector<1x8x32xbf16> to vector<8x32xbf16>
    %c0_2 = arith.constant 0 : index
    %c0_3 = arith.constant 0 : index
    %2 = vector.load %arg2[%c0_2, %c0_3] : memref<32x32xbf16, #tpu.memory_space<vmem>>, vector<32x32xbf16>
    %cst = arith.constant dense<0.000000e+00> : vector<8x32xf32>
    %3 = tpu.matmul %1, %2, %cst {dimension_numbers = #tpu.dot_dimension_numbers<[1], [0], [0], [1], [0, 0, 1, 1], [], []>} : vector<8x32xbf16>, vector<32x32xbf16>, vector<8x32xf32> -> vector<8x32xf32>
    %c0_4 = arith.constant 0 : index
    %c0_5 = arith.constant 0 : index
    %4 = vector.load %arg3[%c0_4, %c0_5] : memref<1x32xf32, #tpu.memory_space<vmem>>, vector<1x32xf32>
    %5 = vector.broadcast %4 : vector<1x32xf32> to vector<8x32xf32>
    %6 = arith.addf %3, %5 : vector<8x32xf32>
    %c0_6 = arith.constant 0 : index
    %c0_7 = arith.constant 0 : index
    %7 = vector.load %arg4[%c0_6, %c0_7] : memref<32x32xbf16, #tpu.memory_space<vmem>>, vector<32x32xbf16>
    %cst_8 = arith.constant dense<0.000000e+00> : vector<8x32xf32>
    %8 = tpu.matmul %1, %7, %cst_8 {dimension_numbers = #tpu.dot_dimension_numbers<[1], [0], [0], [1], [0, 0, 1, 1], [], []>} : vector<8x32xbf16>, vector<32x32xbf16>, vector<8x32xf32> -> vector<8x32xf32>
    %c0_9 = arith.constant 0 : index
    %c0_10 = arith.constant 0 : index
    %9 = vector.load %arg5[%c0_9, %c0_10] : memref<1x32xf32, #tpu.memory_space<vmem>>, vector<1x32xf32>
    %10 = vector.broadcast %9 : vector<1x32xf32> to vector<8x32xf32>
    %11 = arith.addf %8, %10 : vector<8x32xf32>
    %12 = tpu.transpose %6, [1, 0] : vector<8x32xf32> -> vector<32x8xf32>
    %13 = arith.truncf %12 : vector<32x8xf32> to vector<32x8xbf16>
    %c0_11 = arith.constant 0 : index
    %c0_12 = arith.constant 0 : index
    %c0_13 = arith.constant 0 : index
    %14 = vector.load %arg6[%c0_11, %c0_12, %c0_13] : memref<1x32x8xbf16, #tpu.memory_space<vmem>>, vector<1x32x8xbf16>
    %15 = vector.shape_cast %14 : vector<1x32x8xbf16> to vector<32x8xbf16>
    %16 = vector.shape_cast %13 : vector<32x8xbf16> to vector<1x32x8xbf16>
    tpu.vector_store %arg6[%c0_11, %c0_12, %c0_13], %16 {strides = array<i32>} : memref<1x32x8xbf16, #tpu.memory_space<vmem>>, vector<1x32x8xbf16>,
    %17 = arith.truncf %11 : vector<8x32xf32> to vector<8x32xbf16>
    %c0_14 = arith.constant 0 : index
    %c0_15 = arith.constant 0 : index
    %c0_16 = arith.constant 0 : index
    %18 = vector.load %arg7[%c0_14, %c0_15, %c0_16] : memref<1x8x32xbf16, #tpu.memory_space<vmem>>, vector<1x8x32xbf16>
    %19 = vector.shape_cast %18 : vector<1x8x32xbf16> to vector<8x32xbf16>
    %20 = vector.shape_cast %17 : vector<8x32xbf16> to vector<1x8x32xbf16>
    tpu.vector_store %arg7[%c0_14, %c0_15, %c0_16], %20 {strides = array<i32>} : memref<1x8x32xbf16, #tpu.memory_space<vmem>>, vector<1x8x32xbf16>,
    return
  }
  func.func @transform_0(%arg0: i32) -> (i32, i32, i32) {
    %c0_i32 = arith.constant 0 : i32
    %c0_i32_0 = arith.constant 0 : i32
    %c0_i32_1 = arith.constant 0 : i32
    return %arg0, %c0_i32, %c0_i32_0 : i32, i32, i32
  }
  func.func @transform_1(%arg0: i32) -> (i32, i32) {
    %c0_i32 = arith.constant 0 : i32
    %c0_i32_0 = arith.constant 0 : i32
    %c0_i32_1 = arith.constant 0 : i32
    return %c0_i32, %c0_i32_0 : i32, i32
  }
  func.func @transform_2(%arg0: i32) -> (i32, i32) {
    %c0_i32 = arith.constant 0 : i32
    %c0_i32_0 = arith.constant 0 : i32
    %c0_i32_1 = arith.constant 0 : i32
    return %c0_i32, %c0_i32_0 : i32, i32
  }
  func.func @transform_3(%arg0: i32) -> (i32, i32) {
    %c0_i32 = arith.constant 0 : i32
    %c0_i32_0 = arith.constant 0 : i32
    %c0_i32_1 = arith.constant 0 : i32
    return %c0_i32, %c0_i32_0 : i32, i32
  }
  func.func @transform_4(%arg0: i32) -> (i32, i32) {
    %c0_i32 = arith.constant 0 : i32
    %c0_i32_0 = arith.constant 0 : i32
    %c0_i32_1 = arith.constant 0 : i32
    return %c0_i32, %c0_i32_0 : i32, i32
  }
  func.func @transform_5(%arg0: i32) -> (i32, i32, i32) {
    %c0_i32 = arith.constant 0 : i32
    %c0_i32_0 = arith.constant 0 : i32
    %c0_i32_1 = arith.constant 0 : i32
    return %arg0, %c0_i32, %c0_i32_0 : i32, i32, i32
  }
  func.func @transform_6(%arg0: i32) -> (i32, i32, i32) {
    %c0_i32 = arith.constant 0 : i32
    %c0_i32_0 = arith.constant 0 : i32
    %c0_i32_1 = arith.constant 0 : i32
    return %arg0, %c0_i32, %c0_i32_0 : i32, i32, i32
  }
}

</mosaic_0001>

<bundles_post_ra>
// kernel: tpu_custom_call.1
= control target key start
LH: loop header
LB: loop body
LE: loop exit
PB: predicated region body
PF: predicated region fallthrough
CT: control target
= control target key end

     0   :  { %12 = vsyncpa [#allocation3], 0  ;;  %s1204_s0 = inlined_call_operand.hbm [shape: bf16[2,8,32], index: 0, kind: input, shape index: {}]   ;;  %s1205_s1 = inlined_call_operand.hbm [shape: bf16[32,32], index: 1, kind: input, shape index: {}]   ;;  %s1206_s2 = inlined_call_operand.vmem [shape: f32[1,32], index: 2, kind: input, shape index: {}]   ;;  %s1207_s3 = inlined_call_operand.hbm [shape: bf16[32,32], index: 3, kind: input, shape index: {}]   ;;  %s1208_s4 = inlined_call_operand.vmem [shape: f32[1,32], index: 4, kind: input, shape index: {}]   ;;  %s1209_s5 = inlined_call_operand.vmem [shape: bf16[2,32,8], index: 5, kind: output, shape index: {0}]   ;;  %s1210_s6 = inlined_call_operand.hbm [shape: bf16[2,8,32], index: 6, kind: output, shape index: {1}]  }
   0x1   :  { %14 = vsyncpa [#allocation3 + $0x1], 0 }
   0x2   :  { %15 = vsyncpa [#allocation6], 0 }
   0x3   :  { %16 = vsyncpa [#allocation4], 0 }
   0x4   :  { %18 = vsyncpa [#allocation4 + $0x1], 0  ;;  %s966_s21 = smov 0   ;;  %s968_s22 = smov 0  }
   0x5   :  { %s970_s23 = smov 0   ;;  %s972_s24 = smov 0  }
   0x6 LB: > { %s987_s25 = sadd.s32 4294967295, %s921_s24   ;;  %s633_s26 = sadd.s32 4294967294, %s921_s24   ;;  %s921_s24 = sphi %s972_s24, %s1230_s24   ;;  %s917_s23 = sphi %s970_s23, %s1229_s23   ;;  %s913_s22 = sphi %s968_s22, %s1228_s22   ;;  %s909_s21 = sphi %s966_s21, %s1227_s21  }
   0x7   : > { %p44_p0 = scmp.ne.s32.totalorder %s913_s22, %s909_s21  ;;  %p1211_p1 = scmp.eq.s32.totalorder %s987_s25, 0 }
   0x8   : > { %p184_p3 = scmp.eq.s32.totalorder %s633_s26, 1  ;;  %p634_p5 = scmp.ge.s32.totalorder %s921_s24, 1 }
   0x9   : > { %p996_p4 = por %p1211_p1, %p44_p0  ;;  %p191_p7 = scmp.lt.s32.totalorder %s921_s24, 3 }
   0xa   : > { %p1001_p6 = por %p184_p3, %p44_p0  ;;  %s923_s30 = smov [#allocation5]  }
   0xb   : > { %s1214_s27 = scalar_select %p996_p4, 1, 0 }
   0xc   : > { %s1215_s28 = scalar_select %p1001_p6, 1, 0 }
   0xd   : > { %p1006_p8 = pnand %p634_p5, %p191_p7  ;;  %s203_s7 = sshll.u32 %s923_s30, 4  ;;  %s1010_s7 = int_to_ptr.vmem [resolvable:$true] %s203_s7 }
   0xe   : > { %s924_s9 = smov [#allocation7]   ;;  %s765_s13 = scalar_lea.hbm %s1205_s1, 256 }
   0xf   : > { %p702_p9 = pneg %p1006_p8  ;;  %s219_s10 = sshll.u32 %s924_s9, 4  ;;  %s1021_s10 = int_to_ptr.vmem [resolvable:$true] %s219_s10 }
  0x10   : > { %p766_p12 = scmp.ne.s32.totalorder %s1205_s1, %s765_s13  ;;  %p772_p5 = scmp.lt.u32.totalorder %s765_s13, %s1205_s1 }
  0x11   : > { %p1017_p11 = pnand %p702_p9, %p1211_p1 }
  0x13   : > { %p767_p13 = pneg %p1017_p11 }
  0x15   : > { %p768_p0 = pnand %p767_p13, %p766_p12 }
  0x17   : > { %p769_p3 = pneg %p768_p0 }
  0x19   : > { %p774_p7 = pnand %p772_p5, %p769_p3 }
  0x1b   : > { %777 = shalt.err (!%p774_p7)
}
  0x1c   : > { %s778_s18 = scalar_lea.vmem %s1010_s7, 256  ;;  %p786_p2 = scmp.lt.s32.totalorder %s1010_s7, %s1010_s7 }
  0x1d   : > { %p779_p9 = scmp.ne.s32.totalorder %s1010_s7, %s778_s18  ;;  %p787_p12 = scmp.lt.s32.totalorder %s778_s18, %s778_s18 }
  0x1f   : > { %p781_p10 = pnand %p779_p9, %p767_p13  ;;  %p788_p0 = por %p787_p12, %p786_p2 }
  0x21   : > { %p782_p1 = pneg %p781_p10 }
  0x23   : > { %p789_p6 = pnand %p788_p0, %p782_p1 }
  0x25   : > { %792 = shalt.err (!%p789_p6)
}
  0x26   : > { %s925_s19 = smov 64   ;;  %s926_s20 = smov 4  }
  0x27   : > { %705 = dma.hbm_to_vmem [thread:$0]  (!%p1017_p11), %s1205_s1, 256, %s1010_s7, [#allocation6], %s925_s19, %s925_s19, %s926_s20  }
  0x28   : > { %s793_s12 = scalar_lea.hbm %s1207_s3, 256 }
  0x29   : > { %p794_p2 = scmp.ne.s32.totalorder %s1207_s3, %s793_s12  ;;  %p800_p10 = scmp.lt.u32.totalorder %s793_s12, %s1207_s3 }
  0x2b   : > { %p796_p1 = pnand %p794_p2, %p767_p13 }
  0x2d   : > { %p797_p6 = pneg %p796_p1 }
  0x2f   : > { %p802_p3 = pnand %p800_p10, %p797_p6 }
  0x31   : > { %805 = shalt.err (!%p802_p3)
}
  0x32   : > { %s806_s7 = scalar_lea.vmem %s1021_s10, 256  ;;  %p814_p12 = scmp.lt.s32.totalorder %s1021_s10, %s1021_s10 }
  0x33   : > { %p807_p5 = scmp.ne.s32.totalorder %s1021_s10, %s806_s7  ;;  %p815_p0 = scmp.lt.s32.totalorder %s806_s7, %s806_s7 }
  0x35   : > { %p809_p7 = pnand %p807_p5, %p767_p13  ;;  %p816_p2 = por %p815_p0, %p814_p12 }
  0x37   : > { %p810_p9 = pneg %p809_p7 }
  0x39   : > { %p817_p1 = pnand %p816_p2, %p810_p9 }
  0x3b   : > { %820 = shalt.err (!%p817_p1)
}
  0x3c   : > { %708 = dma.hbm_to_vmem [thread:$0]  (!%p1017_p11), %s1207_s3, 256, %s1021_s10, [#allocation6], %s925_s19, %s925_s19, %s926_s20  }
  0x3d   : > { %s1076_s26 = sadd.s32 1, %s921_s24   ;;  %s31_s8 = sadd.s32 1, %s917_s23 }
  0x3e   : > { %s28_s30 = ssub.s32 %s921_s24, %s1076_s26  ;;  %p38_p13 = scmp.ne.s32.totalorder %s917_s23, %s913_s22 }
  0x3f   : > { %p29_p6 = scmp.eq.s32.totalorder %s28_s30, 0  ;;  %p39_p10 = scmp.eq.s32.totalorder %s921_s24, 0 }
  0x40   : > { %p1218_p3 = scmp.eq.s32.totalorder %s987_s25, 1  ;;  %p719_p7 = scmp.lt.s32.totalorder %s921_s24, 2 }
  0x41   : > { %s1092_s11 = scalar_select %p29_p6, %s917_s23, %s31_s8  }
  0x42   : > { %p1086_p5 = por %p1218_p3, %p38_p13  ;;  %p40_p9 = por %p39_p10, %p38_p13 }
  0x43   : > { %s236_s12 = sand.u32 1, %s917_s23   ;;  %s639_s10 = sshll.u32 %s921_s24, 6 }
  0x44   : > { %s1219_s9 = scalar_select %p1086_p5, 1, 0 }
  0x45   : > { %s638_s13 = sshll.u32 %s236_s12, 2  ;;  %s1099_s14 = scalar_lea.hbm %s1204_s0, %s639_s10 }
  0x46   : > { %s240_s15 = scalar_lea.vmem [#allocation2], %s638_s13  ;;  %p1103_p11 = pnand %p719_p7, %p40_p9 }
  0x47   : > { %s247_s16 = sshll.u32 %s240_s15, 4  ;;  %s237_s17 = scalar_lea.sflag [#allocation3], %s236_s12  ;;  %s1101_s16 = int_to_ptr.vmem [resolvable:$true] %s247_s16 }
  0x48   : > { %s821_s18 = scalar_lea.hbm %s1099_s14, 64  ;;  %p823_p0 = pneg %p1103_p11 }
  0x49   : > { %p822_p12 = scmp.ne.s32.totalorder %s1099_s14, %s821_s18  ;;  %s826_s13 = scalar_lea.hbm %s1204_s0, 128 }
  0x4a   : > { %p827_p13 = scmp.lt.u32.totalorder %s1099_s14, %s1204_s0  ;;  %p828_p6 = scmp.lt.u32.totalorder %s826_s13, %s821_s18 }
  0x4b   : > { %p824_p2 = pnand %p823_p0, %p822_p12  ;;  %p830_p3 = scmp.lt.u32.totalorder %s821_s18, %s1099_s14 }
  0x4c   : > { %p829_p10 = por %p828_p6, %p827_p13 }
  0x4d   : > { %p825_p1 = pneg %p824_p2 }
  0x4e   : > { %p831_p7 = por %p830_p3, %p829_p10 }
  0x50   : > { %p832_p9 = pnand %p831_p7, %p825_p1 }
  0x52   : > { %835 = shalt.err (!%p832_p9)
}
  0x53   : > { %s836_s12 = scalar_lea.vmem %s1101_s16, 64  ;;  %s927_s20 = smov [#allocation2]  }
  0x54   : > { %p837_p12 = scmp.ne.s32.totalorder %s1101_s16, %s836_s12  ;;  %s841_s15 = sshll.u32 %s927_s20, 4  ;;  %s842_s15 = int_to_ptr.vmem [resolvable:$false] %s841_s15 }
  0x55   : > { %s843_s8 = scalar_lea.vmem %s842_s15, 128  ;;  %p844_p4 = scmp.lt.s32.totalorder %s1101_s16, %s842_s15 }
  0x56   : > { %p839_p2 = pnand %p837_p12, %p823_p0  ;;  %p845_p13 = scmp.lt.s32.totalorder %s843_s8, %s836_s12 }
  0x58   : > { %p840_p5 = pneg %p839_p2  ;;  %p846_p6 = por %p845_p13, %p844_p4 }
  0x5a   : > { %p847_p10 = pnand %p846_p6, %p840_p5 }
  0x5c   : > { %850 = shalt.err (!%p847_p10)
}
  0x5d   : > { %712 = dma.hbm_to_vmem [thread:$0]  (!%p1103_p11), %s1099_s14, 64, %s1101_s16, %s237_s17  }
  0x5e   : > { %256 = sbr.rel (%p1006_p8) target bundleno = 473 (0x1d9), region = 40  ;;  %s1135_s18 = sand.u32 (!%p1006_p8), 1, %s913_s22  }
  0x5f   : > { %s641_s30 = sshll.u32 (!%p1006_p8), %s1135_s18, 2  ;;  %s259_s13 = scalar_lea.sflag (!%p1006_p8), [#allocation3], %s1135_s18 }
  0x60   : > { %s262_s10 = scalar_lea.vmem (!%p1006_p8), [#allocation2], %s641_s30  ;;  %p1221_p4 = scmp.ne.s32.totalorder (!%p1006_p8), %s1214_s27, 0 }
  0x65   : > { %896 = dma.done.wait (%p1221_p4), %s259_s13, 64  }
  0x66   : > { %898 = vsyncadd (%p1221_p4), %s259_s13, 4294967232  ;;  %p1222_p5 = scmp.eq.s32.totalorder %s987_s25, 0 }
  0x68   : > { %900 = dma.done.wait (%p1222_p5), [#allocation6], 512   ;;  %p1223_p8 = pmov %p1222_p5 }
  0x69   : > { %v928_v0 = vmov 0.0   ;;  %vm929_vm0 = vmmov 0   ;;  %v761_v1 = vld [vmem:[#allocation5] sm:$0xff]   ;;  %v762_v2 = vld [vmem:[#allocation5 + $0x8] sm:$0xff]   ;;  %v763_v3 = vld [vmem:[#allocation7] sm:$0xff]   ;;  %vm334_vm1 = vcmask 261120  }
  0x6a   : > { %902 = vsyncadd (%p1223_p8), [#allocation6], 4294966784  ;;  %674 = vmatprep.subr.bf16.mxu0 %v928_v0  ;;  %678 = vmatprep.mubr.msk.bf16.mxu0 %vm929_vm0, %v928_v0  ;;  %v764_v4 = vld [vmem:[#allocation7 + $0x8] sm:$0xff]   ;;  %vm495_vm2 = vcmask 257024   ;;  %s660_s7 = sshll.u32 %s987_s25, 6  ;;  %s303_s17 = scalar_lea.vmem [#allocation8], %s641_s30 }
  0x6b   : > { %682 = vmatprep.subr.bf16.mxu1 %v928_v0  ;;  %686 = vmatprep.mubr.msk.bf16.mxu1 %vm929_vm0, %v928_v0  ;;  %v310_v5 = vld [vmem:[%s262_s10] sm:$0xf]  ;;  %s519_s19 = sshll.u32 %s303_s17, 4  ;;  %s1161_s15 = scalar_lea.hbm %s1210_s6, %s660_s7  ;;  %s520_s19 = int_to_ptr.vmem [resolvable:$true] %s519_s19 }
  0x6c   : > { %675 = vmatpush3.bf16.msra.mxu0 %v761_v1  ;;  %683 = vmatpush3.bf16.msra.mxu1 %v763_v3  ;;  %v647_v6 = vld [vmem:[%s1206_s2] ss:$0 sm:$0xff]  ;;  %s503_s8 = scalar_lea.sflag [#allocation4], %s1135_s18  ;;  %s851_s13 = scalar_lea.vmem %s520_s19, 64 }
  0x6d   : > { %676 = vmatprep.subr.bf16.mxu0 %v928_v0  ;;  %684 = vmatprep.subr.bf16.mxu1 %v928_v0  ;;  %v651_v13 = vld [vmem:[%s1208_s4] ss:$0 sm:$0xff]  ;;  %p852_p11 = scmp.ne.s32.totalorder %s520_s19, %s851_s13  ;;  %p1224_p0 = scmp.ne.s32.totalorder %s1219_s9, 0 }
  0x6e   : > { %s930_s10 = smov [#allocation8]  }
  0x6f   : > { %p853_p1 = pnand %p852_p11, %p1224_p0  ;;  %s855_s27 = sshll.u32 %s930_s10, 4  ;;  %s856_s27 = int_to_ptr.vmem [resolvable:$false] %s855_s27 }
  0x70   : > { %677 = vmatpush3.bf16.msra.mxu0 %v762_v2  ;;  %685 = vmatpush3.bf16.msra.mxu1 %v764_v4  ;;  %s857_s29 = scalar_lea.vmem %s856_s27, 128  ;;  %p858_p7 = scmp.lt.s32.totalorder %s520_s19, %s856_s27 }
  0x71   : > { %p854_p3 = pneg %p853_p1  ;;  %p859_p9 = scmp.lt.s32.totalorder %s857_s29, %s851_s13 }
  0x73   : > { %679 = vmatmul.mubr.msk.bf16.vlgmr.msra.gmra.mrb[0].mxu0 %vm334_vm1, %v310_v5  ;;  %687 = vmatmul.mubr.msk.bf16.vlgmr.msra.gmra.mrb[0].mxu1 %vm334_vm1, %v310_v5  ;;  %p860_p12 = por %p859_p9, %p858_p7 }
  0x75   : > { %p861_p2 = pnand %p860_p12, %p854_p3 }
 0x146   : > { %v372_v7 = vpop.f32.mrb[0].mxu0  ;;  %v435_v12 = vpop.f32.mrb[0].mxu1 }
 0x147   : > { %v680_v8 = vpop.f32.mrb[1].mxu0  ;;  %v373_v9 = vadd.f32 %v647_v6, %v372_v7  ;;  %v688_v14 = vpop.f32.mrb[1].mxu1  ;;  %v436_v15 = vadd.f32 %v651_v13, %v435_v12 }
 0x148   : > { %v375_v10 = vpop.f32.mrb[2].mxu0  ;;  %v438_v16 = vpop.f32.mrb[2].mxu1 }
 0x149   : > { %441 = vxpose.xlu0.b32.start.end [1/1] (short) (narrow) %v373_v9, 32  ;;  %v681_v11 = vpop.f32.mrb[3].mxu0  ;;  %v689_v17 = vpop.f32.mrb[3].mxu1  ;;  %v494_v18 = vpack.c.bf16 %v436_v15, %v436_v15 }
 0x14b   : > { %496 = vst.msk [vmem:[%s303_s17] sm:$0xf] %vm495_vm2, %v494_v18 }
 0x14c   : > { %864 = shalt.err (!%p861_p2)
}
 0x14d   : > { %s865_s18 = scalar_lea.hbm %s1161_s15, 64  ;;  %s869_s16 = scalar_lea.hbm %s1210_s6, 128 }
 0x14e   : > { %p866_p13 = scmp.ne.s32.totalorder %s1161_s15, %s865_s18  ;;  %p870_p4 = scmp.lt.u32.totalorder %s1161_s15, %s1210_s6 }
 0x14f   : > { %p871_p5 = scmp.lt.u32.totalorder %s869_s16, %s865_s18  ;;  %p873_p11 = scmp.lt.u32.totalorder %s865_s18, %s1161_s15 }
 0x150   : > { %p867_p6 = pnand %p866_p13, %p1224_p0 }
 0x151   : > { %p872_p8 = por %p871_p5, %p870_p4 }
 0x152   : > { %p868_p10 = pneg %p867_p6 }
 0x153   : > { %p874_p1 = por %p873_p11, %p872_p8 }
 0x155   : > { %p875_p3 = pnand %p874_p1, %p868_p10 }
 0x157   : > { %878 = shalt.err (!%p875_p3)
}
 0x158   : > { %700 = dma.vmem_to_hbm [thread:$0]  (%p1224_p0), %s520_s19, 64, %s1161_s15, %s503_s8   ;;  %vm489_vm3 = vcmask 60416  }
 0x159   : > { %p304_p7 = scmp.lt.s32.totalorder %s987_s25, 1 }
 0x15b   : > { %s1232_s25 = smov (!%p304_p7, %s987_s25), 1 }
 0x15c   : > { %s663_s12 = sshll.u32 %s1232_s25, 4 }
 0x15d   : > { %s308_s10 = scalar_lea.vmem %s1209_s5, %s663_s12 }
 0x1c9   : > { %v457_v19 = vpop.trf.xlu0 }
 0x1ca   : > { %v664_v20 = vpack.c.bf16 %v457_v19, %v457_v19 }
 0x1cc   : > { %490 = vst.msk [vmem:[%s308_s10] sm:$0xf] %vm489_vm3, %v664_v20 }
 0x1cd   : > { %v458_v21 = vpop.trf.xlu0 }
 0x1ce   : > { %v665_v22 = vpack.c.bf16 %v458_v21, %v458_v21 }
 0x1d0   : > { %491 = vst.msk [vmem:[%s308_s10 + $0x4] sm:$0xf] %vm489_vm3, %v665_v22 }
 0x1d1   : > { %v459_v23 = vpop.trf.xlu0 }
 0x1d2   : > { %v666_v24 = vpack.c.bf16 %v459_v23, %v459_v23 }
 0x1d4   : > { %492 = vst.msk [vmem:[%s308_s10 + $0x8] sm:$0xf] %vm489_vm3, %v666_v24 }
 0x1d5   : > { %v460_v25 = vpop.trf.xlu0 }
 0x1d6   : > { %v667_v26 = vpack.c.bf16 %v460_v25, %v460_v25 }
 0x1d8   : > { %493 = vst.msk [vmem:[%s308_s10 + $0xc] sm:$0xf] %vm489_vm3, %v667_v26 }
 0x1d9 PF: > { %s539_s25 = sand.u32 1, %s909_s21   ;;  %p1225_p0 = scmp.ne.s32.totalorder %s1215_s28, 0 }
 0x1da   : > { %p1226_p9 = scmp.ge.s32.totalorder %s921_s24, 2  ;;  %s540_s9 = scalar_lea.sflag [#allocation4], %s539_s25 }
 0x1dc   : > { %p714_p12 = pnand %p1226_p9, %p1225_p0 }
 0x1de   : > { %904 = dma.done.wait (!%p714_p12), %s540_s9, 64  }
 0x1df   : > { %906 = vsyncadd (!%p714_p12), %s540_s9, 4294967232  ;;  %p21_p2 = scmp.ge.s32.totalorder %s1076_s26, 4   ;;  %s1227_s21 = smov %s913_s22 }
 0x1e0   : > { %s1228_s22 = smov %s917_s23  ;;  %s1229_s23 = smov %s1092_s11 }
 0x1e1   : > { %s1230_s24 = smov %s1076_s26  ;;  %23 = sbr.rel (!%p21_p2) target bundleno = 6 (0x6), region = 105 }
 0x1e8   :  { %545 = vsyncpa [#allocation3], 1 }
 0x1e9   :  { %547 = vsyncpa [#allocation3 + $0x1], 1 }
 0x1ea   :  { %548 = vsyncpa [#allocation6], 1 }
 0x1eb   :  { %549 = vsyncpa [#allocation4], 1 }
 0x1ec   :  { %551 = vsyncpa [#allocation4 + $0x1], 1 }

</bundles_post_ra>
